<compile_context>
chip_gen: v7x
topology: tpu7x:2x2x1
jax: 0.10.0
libtpu: 0.0.40
codegen_flags: <defaults>
</compile_context>

<pallas_src>
import jax
import jax.numpy as jnp
from jax.experimental import pallas as pl
from jax.experimental.pallas import tpu as pltpu


def _round_up(n, m):
    return ((n + m - 1) // m) * m


# ----------------------------------- kernel -----------------------------------

def cefe_kernel(x_ref, w1_ref, b1_ref, w2_ref, b2_ref, out_ref):
    # Fused layer 1 (course dense + 4x fine dense):
    #   [TB, D]bf16 @ [D, N1]bf16 -> f32 acc, + bias, ReLU
    x = x_ref[...].astype(jnp.bfloat16)            # no-op if input is already bf16
    h = jnp.dot(x, w1_ref[...], preferred_element_type=jnp.float32) + b1_ref[...]
    h = jnp.maximum(h, 0.0).astype(jnp.bfloat16)
    # Fused layer 2 (course dense_2 + 4x fine dense_3 over cat([h_f, hidden])):
    #   [TB, N1]bf16 @ [N1, 128]bf16 -> f32 acc, + bias, Sigmoid
    logits = jnp.dot(h, w2_ref[...], preferred_element_type=jnp.float32) + b2_ref[...]
    out_ref[...] = jax.nn.sigmoid(logits)


# ----------------------------- weight packing (host) ---------------------------

def pack_params(params, bert_dim, dense_hid_dim):
    """Packs the per-head Linear weights into two lane-dense fused bf16 slabs.

    Fused layer-1 output lanes (columns of W1):
        [0:H]               -> course hidden
        [H*(1+f):H*(2+f)]   -> fine head f hidden   (f = 0..3)
        [5H:N1]             -> zero padding
    Fused layer-2 output lanes (columns of W2):
        [0:4]               -> coarse logits
        [4+4f:8+4f]         -> fine head f logits
        [20:128]            -> zero padding
    """
    cw1, cb1, cw2, cb2, fw1, fb1, fw3, fb3 = params
    D, H = bert_dim, dense_hid_dim
    # NOTE: with small H most of N1 is zero padding; harmless while memory-bound on x.
    N1 = _round_up(5 * H, 128)
    NO = 128  # lane-dense output slab width (>= 20)

    w1 = jnp.zeros((D, N1), jnp.float32)
    b1 = jnp.zeros((1, N1), jnp.float32)
    w1 = w1.at[:, 0:H].set(cw1)
    b1 = b1.at[:, 0:H].set(cb1)
    for f in range(4):
        lo = H * (1 + f)
        w1 = w1.at[:, lo:lo + H].set(fw1[f])
        b1 = b1.at[:, lo:lo + H].set(fb1[f])

    w2 = jnp.zeros((N1, NO), jnp.float32)
    b2 = jnp.zeros((1, NO), jnp.float32)
    # coarse head: hidden @ cw2
    w2 = w2.at[0:H, 0:4].set(cw2)
    b2 = b2.at[:, 0:4].set(cb2)
    for f in range(4):
        col = 4 + 4 * f
        row = H * (1 + f)
        # fine logits_f = h_f @ fw3[f][:H] + hidden @ fw3[f][H:] + fb3[f]
        # (PyTorch does dense_3(cat([h_f, hidden], dim=1)))
        w2 = w2.at[row:row + H, col:col + 4].set(fw3[f][:H])
        w2 = w2.at[0:H, col:col + 4].set(fw3[f][H:])
        b2 = b2.at[:, col:col + 4].set(fb3[f])

    # Weights in bf16 (bf16-native MXU path, half the HBM/VMEM bytes);
    # biases stay f32 since they are added to the f32 accumulator.
    return w1.astype(jnp.bfloat16), b1, w2.astype(jnp.bfloat16), b2


# ---------------------------------- wrapper ------------------------------------

def cefe_bert_forward(bert_embedding, packed, *, block_b=1024):
    """Runs the fused course_pred + 4x fine_pred head as one tiled Pallas kernel."""
    w1, b1, w2, b2 = packed
    B, D = bert_embedding.shape
    assert w1.shape[0] == D, "embedding width does not match packed weights"
    N1, NO = w2.shape

    x = bert_embedding                             # native dtype, no wrapper copies/pads
    x_itemsize = jnp.dtype(x.dtype).itemsize
    sub = max(8, 32 // max(x_itemsize, 1))         # sublane granularity: 8 f32, 16 bf16

    # Batch tile: big enough to amortize per-grid-step overhead, but capped at
    # ~ceil(B/2) so the "parallel" grid has >=2 steps and both v7x TCs get work.
    TB = min(block_b, _round_up(max(pl.cdiv(B, 2), 1), sub))
    grid_b = pl.cdiv(B, TB)                        # ragged last tile masked by Pallas

    # Scoped-VMEM sizing: double-buffered x/out tiles + resident weights + f32 temps.
    vmem_need = (2 * TB * D * x_itemsize
                 + 2 * TB * NO * 4
                 + D * N1 * 2 + N1 * NO * 2
                 + (N1 + NO) * 4
                 + TB * (N1 + NO) * 4)
    vmem_limit = int(min(max(2 * vmem_need, 32 << 20), 56 << 20))

    out = pl.pallas_call(
        cefe_kernel,
        out_shape=jax.ShapeDtypeStruct((B, NO), jnp.float32),
        grid=(grid_b,),
        in_specs=[
            pl.BlockSpec((TB, D), lambda i: (i, 0)),    # streamed batch tile
            pl.BlockSpec((D, N1), lambda i: (0, 0)),    # weights: constant index -> resident
            pl.BlockSpec((1, N1), lambda i: (0, 0)),
            pl.BlockSpec((N1, NO), lambda i: (0, 0)),
            pl.BlockSpec((1, NO), lambda i: (0, 0)),
        ],
        out_specs=pl.BlockSpec((TB, NO), lambda i: (i, 0)),
        compiler_params=pltpu.CompilerParams(
            dimension_semantics=("parallel",),          # shard batch axis across TCs
            vmem_limit_bytes=vmem_limit),
    )(x, w1, b1, w2, b2)

    coarse = out[:, :4]                                  # courseGrainedErrorPred
    fine = out[:, 4:20]                                  # fineGrainedErrorPred
    return coarse, fine


# ------------------------- deterministic parameter init -------------------------

def _xavier(key, shape):
    fan_in, fan_out = shape[-2], shape[-1]
    bound = (6.0 / (fan_in + fan_out)) ** 0.5
    return jax.random.uniform(key, shape, jnp.float32, -bound, bound)


def init_params(key, bert_dim, dense_hid_dim):
    """Weights stored pre-transposed as [in, out] so y = x @ W + b.

    The PyTorch module zero-inits all biases; small random biases are used here
    instead so the bias-packing path is actually exercised by the numeric check.
    """
    D, H = bert_dim, dense_hid_dim
    ks = jax.random.split(key, 8)
    cw1 = _xavier(ks[0], (D, H))                      # course dense:   Linear(D -> H)
    cb1 = 0.01 * jax.random.normal(ks[1], (1, H), jnp.float32)
    cw2 = _xavier(ks[2], (H, 4))                      # course dense_2: Linear(H -> 4)
    cb2 = 0.01 * jax.random.normal(ks[3], (1, 4), jnp.float32)
    fw1 = _xavier(ks[4], (4, D, H))                   # 4x fine dense:  Linear(D -> H)
    fb1 = 0.01 * jax.random.normal(ks[5], (4, 1, H), jnp.float32)
    fw3 = _xavier(ks[6], (4, 2 * H, 4))               # 4x fine dense_3: Linear(2H -> 4)
    fb3 = 0.01 * jax.random.normal(ks[7], (4, 1, 4), jnp.float32)
    return (cw1, cb1, cw2, cb2, fw1, fb1, fw3, fb3)


# ------------------------------- pure-JAX reference ------------------------------

def reference_forward(x, params):
    cw1, cb1, cw2, cb2, fw1, fb1, fw3, fb3 = params
    hidden = jnp.maximum(x @ cw1 + cb1, 0.0)
    coarse = jax.nn.sigmoid(hidden @ cw2 + cb2)
    fines = []
    for f in range(4):
        h_f = jnp.maximum(x @ fw1[f] + fb1[f], 0.0)
        cat = jnp.concatenate([h_f, hidden], axis=1)           # cat([h_f, course_hid])
        fines.append(jax.nn.sigmoid(cat @ fw3[f] + fb3[f]))
    return coarse, jnp.concatenate(fines, axis=1)


if __name__ == "__main__":
    BERT_DIM, DENSE_HID = 128, 32                      # small synthetic shapes

    key = jax.random.PRNGKey(0)
    k_p, k_x1, k_x2, k_x3 = jax.random.split(key, 4)
    params = init_params(k_p, BERT_DIM, DENSE_HID)
    packed = pack_params(params, BERT_DIM, DENSE_HID)

    # --- case 1: tiny f32 batch, single grid step ---
    B1 = 8
    x1 = jax.random.normal(k_x1, (B1, BERT_DIM), jnp.float32)
    c1, f1 = cefe_bert_forward(x1, packed)
    jax.block_until_ready((c1, f1))
    c1_ref, f1_ref = reference_forward(x1, params)
    assert c1.shape == (B1, 4) and f1.shape == (B1, 16)
    assert jnp.allclose(c1, c1_ref, atol=2e-2), float(jnp.max(jnp.abs(c1 - c1_ref)))
    assert jnp.allclose(f1, f1_ref, atol=2e-2), float(jnp.max(jnp.abs(f1 - f1_ref)))

    # --- case 2: f32 batch not divisible by the tile -> multi-step grid + ragged tail ---
    B2 = 50
    x2 = jax.random.normal(k_x2, (B2, BERT_DIM), jnp.float32)
    c2, f2 = cefe_bert_forward(x2, packed, block_b=16)
    jax.block_until_ready((c2, f2))
    c2_ref, f2_ref = reference_forward(x2, params)
    assert c2.shape == (B2, 4) and f2.shape == (B2, 16)
    assert jnp.allclose(c2, c2_ref, atol=2e-2), float(jnp.max(jnp.abs(c2 - c2_ref)))
    assert jnp.allclose(f2, f2_ref, atol=2e-2), float(jnp.max(jnp.abs(f2 - f2_ref)))

    # --- case 3: native-bf16 embedding, 2 parallel grid steps, ragged last tile ---
    B3 = 48
    x3 = jax.random.normal(k_x3, (B3, BERT_DIM), jnp.float32).astype(jnp.bfloat16)
    c3, f3 = cefe_bert_forward(x3, packed)
    jax.block_until_ready((c3, f3))
    c3_ref, f3_ref = reference_forward(x3.astype(jnp.float32), params)
    assert c3.shape == (B3, 4) and f3.shape == (B3, 16)
    assert jnp.allclose(c3, c3_ref, atol=3e-2), float(jnp.max(jnp.abs(c3 - c3_ref)))
    assert jnp.allclose(f3, f3_ref, atol=3e-2), float(jnp.max(jnp.abs(f3 - f3_ref)))

    print("KERNEL_OK")
</pallas_src>

<mosaic_0001>
module attributes {stable_mosaic.version = 11 : i64} {
  func.func @cefe_kernel(%arg0: i32, %arg1: memref<8x128xf32, #tpu.memory_space<vmem>>, %arg2: memref<128x256xbf16, #tpu.memory_space<vmem>>, %arg3: memref<1x256xf32, #tpu.memory_space<vmem>>, %arg4: memref<256x128xbf16, #tpu.memory_space<vmem>>, %arg5: memref<1x128xf32, #tpu.memory_space<vmem>>, %arg6: memref<8x128xf32, #tpu.memory_space<vmem>>) attributes {dimension_semantics = [#tpu.dimension_semantics<parallel>], iteration_bounds = array<i64: 1>, scalar_prefetch = 0 : i64, scratch_operands = 0 : i64, tpu.core_type = #tpu.core_type<tc>, window_params = [{transform_indices = @transform_0, window_bounds = array<i64: 8, 128>}, {pipeline_mode = #tpu.pipeline_mode<synchronous>, transform_indices = @transform_1, window_bounds = array<i64: 128, 256>}, {pipeline_mode = #tpu.pipeline_mode<synchronous>, transform_indices = @transform_2, window_bounds = array<i64: 1, 256>}, {pipeline_mode = #tpu.pipeline_mode<synchronous>, transform_indices = @transform_3, window_bounds = array<i64: 256, 128>}, {pipeline_mode = #tpu.pipeline_mode<synchronous>, transform_indices = @transform_4, window_bounds = array<i64: 1, 128>}, {transform_indices = @transform_5, window_bounds = array<i64: 8, 128>}]} {
    %c0 = arith.constant 0 : index
    %c0_0 = arith.constant 0 : index
    %0 = vector.load %arg1[%c0, %c0_0] : memref<8x128xf32, #tpu.memory_space<vmem>>, vector<8x128xf32>
    %1 = arith.truncf %0 : vector<8x128xf32> to vector<8x128xbf16>
    %c0_1 = arith.constant 0 : index
    %c0_2 = arith.constant 0 : index
    %2 = vector.load %arg2[%c0_1, %c0_2] : memref<128x256xbf16, #tpu.memory_space<vmem>>, vector<128x256xbf16>
    %cst = arith.constant dense<0.000000e+00> : vector<8x256xf32>
    %3 = tpu.matmul %1, %2, %cst {dimension_numbers = #tpu.dot_dimension_numbers<[1], [0], [0], [1], [0, 0, 1, 1], [], []>} : vector<8x128xbf16>, vector<128x256xbf16>, vector<8x256xf32> -> vector<8x256xf32>
    %c0_3 = arith.constant 0 : index
    %c0_4 = arith.constant 0 : index
    %4 = vector.load %arg3[%c0_3, %c0_4] : memref<1x256xf32, #tpu.memory_space<vmem>>, vector<1x256xf32>
    %5 = vector.broadcast %4 : vector<1x256xf32> to vector<8x256xf32>
    %6 = arith.addf %3, %5 : vector<8x256xf32>
    %cst_5 = arith.constant 0.000000e+00 : f32
    %7 = vector.broadcast %cst_5 : f32 to vector<8x256xf32>
    %8 = arith.maximumf %6, %7 : vector<8x256xf32>
    %9 = arith.truncf %8 : vector<8x256xf32> to vector<8x256xbf16>
    %c0_6 = arith.constant 0 : index
    %c0_7 = arith.constant 0 : index
    %10 = vector.load %arg4[%c0_6, %c0_7] : memref<256x128xbf16, #tpu.memory_space<vmem>>, vector<256x128xbf16>
    %cst_8 = arith.constant dense<0.000000e+00> : vector<8x128xf32>
    %11 = tpu.matmul %9, %10, %cst_8 {dimension_numbers = #tpu.dot_dimension_numbers<[1], [0], [0], [1], [0, 0, 1, 1], [], []>} : vector<8x256xbf16>, vector<256x128xbf16>, vector<8x128xf32> -> vector<8x128xf32>
    %c0_9 = arith.constant 0 : index
    %c0_10 = arith.constant 0 : index
    %12 = vector.load %arg5[%c0_9, %c0_10] : memref<1x128xf32, #tpu.memory_space<vmem>>, vector<1x128xf32>
    %13 = vector.broadcast %12 : vector<1x128xf32> to vector<8x128xf32>
    %14 = arith.addf %11, %13 : vector<8x128xf32>
    %15 = arith.negf %14 : vector<8x128xf32>
    %16 = math.exp %15 : vector<8x128xf32>
    %cst_11 = arith.constant 1.000000e+00 : f32
    %17 = vector.broadcast %cst_11 : f32 to vector<8x128xf32>
    %18 = arith.addf %17, %16 : vector<8x128xf32>
    %19 = arith.divf %17, %18 : vector<8x128xf32>
    %c0_12 = arith.constant 0 : index
    %c0_13 = arith.constant 0 : index
    %20 = vector.load %arg6[%c0_12, %c0_13] : memref<8x128xf32, #tpu.memory_space<vmem>>, vector<8x128xf32>
    tpu.vector_store %arg6[%c0_12, %c0_13], %19 {strides = array<i32>} : memref<8x128xf32, #tpu.memory_space<vmem>>, vector<8x128xf32>,
    return
  }
  func.func @transform_0(%arg0: i32) -> (i32, i32) {
    %c0_i32 = arith.constant 0 : i32
    %c0_i32_0 = arith.constant 0 : i32
    return %arg0, %c0_i32 : i32, i32
  }
  func.func @transform_1(%arg0: i32) -> (i32, i32) {
    %c0_i32 = arith.constant 0 : i32
    %c0_i32_0 = arith.constant 0 : i32
    %c0_i32_1 = arith.constant 0 : i32
    return %c0_i32, %c0_i32_0 : i32, i32
  }
  func.func @transform_2(%arg0: i32) -> (i32, i32) {
    %c0_i32 = arith.constant 0 : i32
    %c0_i32_0 = arith.constant 0 : i32
    %c0_i32_1 = arith.constant 0 : i32
    return %c0_i32, %c0_i32_0 : i32, i32
  }
  func.func @transform_3(%arg0: i32) -> (i32, i32) {
    %c0_i32 = arith.constant 0 : i32
    %c0_i32_0 = arith.constant 0 : i32
    %c0_i32_1 = arith.constant 0 : i32
    return %c0_i32, %c0_i32_0 : i32, i32
  }
  func.func @transform_4(%arg0: i32) -> (i32, i32) {
    %c0_i32 = arith.constant 0 : i32
    %c0_i32_0 = arith.constant 0 : i32
    %c0_i32_1 = arith.constant 0 : i32
    return %c0_i32, %c0_i32_0 : i32, i32
  }
  func.func @transform_5(%arg0: i32) -> (i32, i32) {
    %c0_i32 = arith.constant 0 : i32
    %c0_i32_0 = arith.constant 0 : i32
    return %arg0, %c0_i32 : i32, i32
  }
}

</mosaic_0001>

<bundles_post_ra>
// kernel: tpu_custom_call.1
= control target key start
LH: loop header
LB: loop body
LE: loop exit
PB: predicated region body
PF: predicated region fallthrough
CT: control target
= control target key end

     0   :  { %10 = vsyncpa [#allocation3], 0  ;;  %s710_s0 = inlined_call_operand.hbm [shape: f32[8,128], index: 0, kind: input, shape index: {}]   ;;  %s711_s1 = inlined_call_operand.hbm [shape: bf16[128,256], index: 1, kind: input, shape index: {}]   ;;  %s712_s2 = inlined_call_operand.vmem [shape: f32[1,256], index: 2, kind: input, shape index: {}]   ;;  %s713_s3 = inlined_call_operand.hbm [shape: bf16[256,128], index: 3, kind: input, shape index: {}]   ;;  %s714_s4 = inlined_call_operand.vmem [shape: f32[1,128], index: 4, kind: input, shape index: {}]   ;;  %s715_s5 = inlined_call_operand.hbm [shape: f32[8,128], index: 5, kind: output, shape index: {}]  }
   0x1   :  { %11 = vsyncpa [#allocation6], 0 }
   0x2   :  { %12 = vsyncpa [#allocation4], 0  ;;  %s617_s18 = smov [#allocation5]   ;;  %s523_s22 = scalar_lea.hbm %s711_s1, 2048 }
   0x3   :  { %s28_s19 = sshll.u32 %s617_s18, 4  ;;  %p524_p0 = scmp.ne.s32.totalorder %s711_s1, %s523_s22  ;;  %s29_s19 = int_to_ptr.vmem [resolvable:$true] %s28_s19 }
   0x4   :  { %p527_p1 = scmp.lt.u32.totalorder %s523_s22, %s711_s1 }
   0x6   :  { %p529_p2 = pnand %p527_p1, %p524_p0 }
   0x8   :  { %532 = shalt.err (!%p529_p2)
}
   0x9   :  { %s533_s27 = scalar_lea.vmem %s29_s19, 2048  ;;  %p538_p4 = scmp.lt.s32.totalorder %s29_s19, %s29_s19 }
   0xa   :  { %p534_p3 = scmp.ne.s32.totalorder %s29_s19, %s533_s27  ;;  %p539_p5 = scmp.lt.s32.totalorder %s533_s27, %s533_s27 }
   0xc   :  { %p540_p6 = por %p539_p5, %p538_p4 }
   0xe   :  { %p541_p7 = pnand %p540_p6, %p534_p3 }
  0x10   :  { %544 = shalt.err (!%p541_p7)
}
  0x11   :  { %s618_s28 = smov 128   ;;  %s619_s29 = smov 8  }
  0x12   :  { %34 = dma.hbm_to_vmem [thread:$0]  %s711_s1, 2048, %s29_s19, [#allocation6], %s618_s28, %s618_s28, %s619_s29  }
  0x13   :  { %s620_s7 = smov [#allocation2]   ;;  %s621_s9 = smov [#allocation7]  }
  0x14   :  { %s19_s8 = sshll.u32 %s620_s7, 4  ;;  %s42_s10 = sshll.u32 %s621_s9, 4  ;;  %s20_s8 = int_to_ptr.vmem [resolvable:$true] %s19_s8  ;;  %s43_s10 = int_to_ptr.vmem [resolvable:$true] %s42_s10 }
  0x15   :  { %s545_s13 = scalar_lea.hbm %s710_s0, 128 }
  0x16   :  { %p546_p8 = scmp.ne.s32.totalorder %s710_s0, %s545_s13  ;;  %p549_p9 = scmp.lt.u32.totalorder %s545_s13, %s710_s0 }
  0x18   :  { %p551_p10 = pnand %p549_p9, %p546_p8 }
  0x1a   :  { %554 = shalt.err (!%p551_p10)
}
  0x1b   :  { %s555_s1 = scalar_lea.vmem %s20_s8, 128  ;;  %p560_p12 = scmp.lt.s32.totalorder %s20_s8, %s20_s8 }
  0x1c   :  { %p556_p11 = scmp.ne.s32.totalorder %s20_s8, %s555_s1  ;;  %p561_p13 = scmp.lt.s32.totalorder %s555_s1, %s555_s1 }
  0x1e   :  { %p562_p0 = por %p561_p13, %p560_p12 }
  0x20   :  { %p563_p1 = pnand %p562_p0, %p556_p11 }
  0x22   :  { %566 = shalt.err (!%p563_p1)
}
  0x23   :  { %22 = dma.hbm_to_vmem [thread:$0]  %s710_s0, 128, %s20_s8, [#allocation3]  }
  0x24   :  { %s567_s22 = scalar_lea.hbm %s713_s3, 2048 }
  0x25   :  { %p568_p2 = scmp.ne.s32.totalorder %s713_s3, %s567_s22  ;;  %p571_p3 = scmp.lt.u32.totalorder %s567_s22, %s713_s3 }
  0x27   :  { %p573_p4 = pnand %p571_p3, %p568_p2 }
  0x29   :  { %576 = shalt.err (!%p573_p4)
}
  0x2a   :  { %s577_s27 = scalar_lea.vmem %s43_s10, 2048  ;;  %p582_p6 = scmp.lt.s32.totalorder %s43_s10, %s43_s10 }
  0x2b   :  { %p578_p5 = scmp.ne.s32.totalorder %s43_s10, %s577_s27  ;;  %p583_p7 = scmp.lt.s32.totalorder %s577_s27, %s577_s27 }
  0x2d   :  { %p584_p8 = por %p583_p7, %p582_p6 }
  0x2f   :  { %p585_p9 = pnand %p584_p8, %p578_p5 }
  0x31   :  { %588 = shalt.err (!%p585_p9)
}
  0x32   :  { %s622_s0 = smov 64   ;;  %s623_s28 = smov 4  }
  0x33   :  { %48 = dma.hbm_to_vmem [thread:$0]  %s713_s3, 2048, %s43_s10, [#allocation6], %s622_s0, %s622_s0, %s623_s28  }
  0x34   :  { %611 = dma.done.wait [#allocation3], 128  }
  0x35   :  { %612 = vsyncadd [#allocation3], 4294967168 }
  0x36   :  { %613 = dma.done.wait [#allocation6], 4096  }
  0x37   :  { %614 = vsyncadd [#allocation6], 4294963200  ;;  %v624_v0 = vmov 0   ;;  %v479_v1 = vld [vmem:[#allocation5 + $0x4] ss:$8 sps:$4 sm:$0xff]   ;;  %v507_v15 = vld [vmem:[#allocation7 + $0x50] sm:$0xff]   ;;  %v81_v35 = vlaneseq }
  0x38   :  { %203 = vmatprep.mubr.bf16.mxu0 %v624_v0  ;;  %v481_v2 = vld [vmem:[#allocation5] ss:$8 sps:$4 sm:$0xff]   ;;  %171 = vmatprep.subr.bf16.mxu0 %v479_v1  ;;  %v482_v3 = vld [vmem:[#allocation5 + $0x14] ss:$8 sps:$4 sm:$0xff]   ;;  %v484_v4 = vld [vmem:[#allocation5 + $0x10] ss:$8 sps:$4 sm:$0xff]  }
  0x39   :  { %172 = vmatpush1.bf16.msra.mxu0 %v481_v2  ;;  %v485_v5 = vld [vmem:[#allocation5 + $0x24] ss:$8 sps:$4 sm:$0xff]   ;;  %v487_v6 = vld [vmem:[#allocation5 + $0x20] ss:$8 sps:$4 sm:$0xff]   ;;  %v488_v7 = vld [vmem:[#allocation5 + $0x34] ss:$8 sps:$4 sm:$0xff]  }
  0x3a   :  { %173 = vmatprep.subr.bf16.mxu0 %v482_v3  ;;  %v490_v8 = vld [vmem:[#allocation5 + $0x30] ss:$8 sps:$4 sm:$0xff]   ;;  %v491_v9 = vld [vmem:[#allocation5 + $0x44] ss:$8 sps:$4 sm:$0xff]   ;;  %v493_v12 = vld [vmem:[#allocation5 + $0x40] ss:$8 sps:$4 sm:$0xff]  }
  0x3b   :  { %v503_v10 = vld [vmem:[#allocation7 + $0x40] sm:$0xff]   ;;  %v505_v13 = vld [vmem:[#allocation7 + $0x48] sm:$0xff]   ;;  %v494_v16 = vld [vmem:[#allocation5 + $0x54] ss:$8 sps:$4 sm:$0xff]   ;;  %v82_v36 = vshrl.u32 %v81_v35, 7 }
  0x3c   :  { %v504_v11 = vld [vmem:[#allocation7] sm:$0xff]   ;;  %448 = vmatprep.subr.bf16.mxu1 %v503_v10  ;;  %v506_v14 = vld [vmem:[#allocation7 + $0x8] sm:$0xff]   ;;  %v496_v17 = vld [vmem:[#allocation5 + $0x50] ss:$8 sps:$4 sm:$0xff]  }
  0x3d   :  { %174 = vmatpush1.bf16.msra.mxu0 %v484_v4  ;;  %449 = vmatpush3.bf16.msra.mxu1 %v504_v11  ;;  %v508_v18 = vld [vmem:[#allocation7 + $0x10] sm:$0xff]   ;;  %v509_v19 = vld [vmem:[#allocation7 + $0x58] sm:$0xff]   ;;  %v497_v20 = vld [vmem:[#allocation5 + $0x64] ss:$8 sps:$4 sm:$0xff]   ;;  %v83_v37 = vsub.s32 0, %v82_v36  ;;  %v87_v39 = vsub.s32 1, %v82_v36 }
  0x3e   :  { %175 = vmatprep.subr.bf16.mxu0 %v485_v5  ;;  %450 = vmatprep.subr.bf16.mxu1 %v505_v13  ;;  %v499_v21 = vld [vmem:[#allocation5 + $0x60] ss:$8 sps:$4 sm:$0xff]   ;;  %v500_v22 = vld [vmem:[#allocation5 + $0x74] ss:$8 sps:$4 sm:$0xff]   ;;  %v502_v26 = vld [vmem:[#allocation5 + $0x70] ss:$8 sps:$4 sm:$0xff]  }
  0x3f   :  { %v510_v23 = vld [vmem:[#allocation7 + $0x18] sm:$0xff]   ;;  %v511_v24 = vld [vmem:[#allocation7 + $0x60] sm:$0xff]   ;;  %v513_v28 = vld [vmem:[#allocation7 + $0x68] sm:$0xff]  }
  0x40   :  { %v512_v25 = vld [vmem:[#allocation7 + $0x20] sm:$0xff]   ;;  %v61_v27 = vld [vmem:[#allocation2] sm:$0xff]  ;;  %v514_v30 = vld [vmem:[#allocation7 + $0x28] sm:$0xff]  }
  0x41   :  { %176 = vmatpush1.bf16.msra.mxu0 %v487_v6  ;;  %451 = vmatpush3.bf16.msra.mxu1 %v506_v14  ;;  %v62_v29 = vpack.c.bf16 %v61_v27, %v61_v27  ;;  %v515_v31 = vld [vmem:[#allocation7 + $0x70] sm:$0xff]   ;;  %v517_v33 = vld [vmem:[#allocation7 + $0x78] sm:$0xff]  }
  0x42   :  { %177 = vmatprep.subr.bf16.mxu0 %v488_v7  ;;  %452 = vmatprep.subr.bf16.mxu1 %v507_v15  ;;  %v516_v32 = vld [vmem:[#allocation7 + $0x30] sm:$0xff]   ;;  %v518_v34 = vld [vmem:[#allocation7 + $0x38] sm:$0xff]  }
  0x43   :  { %v79_v38 = vld [vmem:[%s712_s2] sm:$0x3]  ;;  %s625_s2 = smov [#allocation8]  }
  0x44   :  { %v84_v40 = vrot.slane %v79_v38, %v83_v37  ;;  %v88_v41 = vrot.slane %v79_v38, %v87_v39  ;;  %v430_v53 = vld [vmem:[%s714_s4] ss:$0 sm:$0xff]  ;;  %s404_s9 = sshll.u32 %s625_s2, 4  ;;  %s405_s9 = int_to_ptr.vmem [resolvable:$true] %s404_s9 }
  0x45   :  { %178 = vmatpush1.bf16.msra.mxu0 %v490_v8  ;;  %453 = vmatpush3.bf16.msra.mxu1 %v508_v18  ;;  %s589_s10 = scalar_lea.vmem %s405_s9, 128  ;;  %p594_p11 = scmp.lt.s32.totalorder %s405_s9, %s405_s9 }
  0x46   :  { %179 = vmatprep.subr.bf16.mxu0 %v491_v9  ;;  %454 = vmatprep.subr.bf16.mxu1 %v509_v19  ;;  %p590_p10 = scmp.ne.s32.totalorder %s405_s9, %s589_s10  ;;  %p595_p12 = scmp.lt.s32.totalorder %s589_s10, %s589_s10 }
  0x48   :  { %p596_p13 = por %p595_p12, %p594_p11 }
  0x49   :  { %180 = vmatpush1.bf16.msra.mxu0 %v493_v12  ;;  %455 = vmatpush3.bf16.msra.mxu1 %v510_v23 }
  0x4a   :  { %181 = vmatprep.subr.bf16.mxu0 %v494_v16  ;;  %456 = vmatprep.subr.bf16.mxu1 %v511_v24  ;;  %p597_p0 = pnand %p596_p13, %p590_p10 }
  0x4d   :  { %182 = vmatpush1.bf16.msra.mxu0 %v496_v17  ;;  %457 = vmatpush3.bf16.msra.mxu1 %v512_v25 }
  0x4e   :  { %183 = vmatprep.subr.bf16.mxu0 %v497_v20  ;;  %458 = vmatprep.subr.bf16.mxu1 %v513_v28 }
  0x51   :  { %184 = vmatpush1.bf16.msra.mxu0 %v499_v21  ;;  %459 = vmatpush3.bf16.msra.mxu1 %v514_v30 }
  0x52   :  { %185 = vmatprep.subr.bf16.mxu0 %v500_v22  ;;  %460 = vmatprep.subr.bf16.mxu1 %v515_v31 }
  0x55   :  { %186 = vmatpush1.bf16.msra.mxu0 %v502_v26  ;;  %461 = vmatpush3.bf16.msra.mxu1 %v516_v32 }
  0x56   :  { %462 = vmatprep.subr.bf16.mxu1 %v517_v33 }
  0x58   :  { %204 = vmatmul.mubr.bf16.vlgmr.msra.gmra.mrb[0].mxu0 %v62_v29 }
  0x59   :  { %463 = vmatpush3.bf16.msra.mxu1 %v518_v34 }
 0x12b   :  { %v205_v42 = vpop.f32.mrb[0].mxu0 }
 0x12c   :  { %v206_v43 = vadd.f32 %v205_v42, %v84_v40  ;;  %v207_v44 = vpop.f32.mrb[1].mxu0 }
 0x12d   :  { %v208_v45 = vadd.f32 %v207_v44, %v88_v41  ;;  %v209_v46 = vpop.f32.mrb[2].mxu0 }
 0x12e   :  { %v212_v47 = vmax.f32 %v206_v43, 0.0  ;;  %v210_v48 = vpop.f32.mrb[3].mxu0 }
 0x12f   :  { %v213_v49 = vmax.f32 %v208_v45, 0.0 }
 0x130   :  { %v214_v51 = vpack.c.bf16 %v212_v47, %v212_v47 }
 0x131   :  { %v215_v50 = vpack.c.bf16 %v213_v49, %v213_v49 }
 0x133   :  { %383 = vmatprep.mubr.bf16.mxu1 %v215_v50 }
 0x134   :  { %384 = vmatmul.mubr.bf16.vlgmr.msra.gmra.mrb[0].mxu1 %v214_v51 }
 0x207   :  { %v464_v52 = vpop.f32.mrb[0].mxu1 }
 0x208   :  { %v465_v54 = vpop.f32.mrb[1].mxu1 }
 0x209   :  { %v466_v55 = vadd.f32 %v465_v54, %v464_v52  ;;  %v467_v56 = vpop.f32.mrb[2].mxu1 }
 0x20a   :  { %v468_v57 = vpop.f32.mrb[3].mxu1 }
 0x20b   :  { %v386_v58 = vadd.f32 %v466_v55, %v430_v53 }
 0x20d   :  { %v447_v59 = vmul.f32 -1.442695, %v386_v58 }
 0x20f   :  { %519 = vpow2.f32 %v447_v59 }
 0x219   :  { %v520_v60 = vpop.eup %519 }
 0x21a   :  { %v394_v61 = vadd.f32 1.0, %v520_v60 }
 0x21c   :  { %521 = vrcp.f32 %v394_v61 }
 0x226   :  { %v522_v62 = vpop.eup %521 }
 0x227   :  { %397 = vst [vmem:[#allocation8] sm:$0xff] %v522_v62 }
 0x228   :  { %600 = shalt.err (!%p597_p0)
}
 0x229   :  { %s601_s12 = scalar_lea.hbm %s715_s5, 128 }
 0x22a   :  { %p602_p1 = scmp.ne.s32.totalorder %s715_s5, %s601_s12  ;;  %p605_p2 = scmp.lt.u32.totalorder %s601_s12, %s715_s5 }
 0x22c   :  { %p607_p3 = pnand %p605_p2, %p602_p1 }
 0x22e   :  { %610 = shalt.err (!%p607_p3)
}
 0x22f   :  { %407 = dma.vmem_to_hbm [thread:$0]  %s405_s9, 128, %s715_s5, [#allocation4]  }
 0x230   :  { %615 = dma.done.wait [#allocation4], 128  }
 0x231   :  { %616 = vsyncadd [#allocation4], 4294967168 }
 0x232   :  { %411 = vsyncpa [#allocation3], 1 }
 0x233   :  { %412 = vsyncpa [#allocation6], 1 }
 0x234   :  { %413 = vsyncpa [#allocation4], 1 }

</bundles_post_ra>
